<compile_context>
chip_gen: v5e
topology: v5e:2x2
jax: 0.10.0
libtpu: 0.0.40
codegen_flags: <defaults>
</compile_context>

<pallas_src>
import functools

import jax
import jax.numpy as jnp
from jax.experimental import pallas as pl
from jax.experimental.pallas import tpu as pltpu

HIDDEN_FEATURE = 16
LANE = 128            # TPU lane width; output columns padded to this for lane-dense stores
SUBLANE = 8
DEFAULT_TILE_B = 1024
MIN_PALLAS_BATCH = 256  # below this the XLA-fused jnp path beats pallas_call overhead


def _mlp_kernel(x_ref, w1_ref, b1_ref, w2_ref, b2_ref, o_ref):
    x = x_ref[...]        # [TILE_B, in]
    w1 = w1_ref[...]      # [in, H]
    b1 = b1_ref[...]      # [1, H]
    w2 = w2_ref[...]      # [H, OUT_PAD]   (lane-dense padded output columns)
    b2 = b2_ref[...]      # [1, OUT_PAD]

    h = jnp.dot(x, w1, preferred_element_type=jnp.float32) + b1   # linear1
    h = jnp.tanh(h)                                               # tanh (EUP)
    # TODO(synk): nn.Dropout(p=0.5) is identity in eval mode; training-mode masking
    # (pltpu.prng_seed + pltpu.prng_random_bits) is intentionally not emitted here.
    y = jnp.dot(h, w2, preferred_element_type=jnp.float32) + b2   # linear2
    o_ref[...] = y.astype(o_ref.dtype)


def _round_up(n, m):
    return ((n + m - 1) // m) * m


@functools.partial(jax.jit, static_argnames=("tile_b",))
def retailer_model_forward_pallas(x, w1, b1, w2, b2, *, tile_b=DEFAULT_TILE_B):
    batch, in_feature = x.shape
    hidden, out_category = w2.shape

    # Effective batch tile: multiple of 8 sublanes, no bigger than needed.
    eff_tile = min(tile_b, _round_up(batch, SUBLANE))
    eff_tile = max(SUBLANE, _round_up(eff_tile, SUBLANE))
    padded_batch = _round_up(batch, eff_tile)
    num_tiles = padded_batch // eff_tile

    # Pad batch so the grid divides evenly; padded rows are junk and sliced off below.
    if padded_batch != batch:
        x = jnp.pad(x, ((0, padded_batch - batch), (0, 0)))

    # Lane-dense output: pad output columns to a multiple of 128 so the kernel emits
    # full-lane stores instead of masked partial stores. Pure layout plumbing.
    out_pad = _round_up(max(out_category, 1), LANE)
    w2p = jnp.pad(w2, ((0, 0), (0, out_pad - out_category)))
    b2p = jnp.pad(b2, ((0, 0), (0, out_pad - out_category)))

    # VMEM budget: double/triple-buffered x + out tiles plus resident weights, with headroom.
    tile_bytes = eff_tile * (in_feature + out_pad) * 4
    weight_bytes = (in_feature * hidden + hidden + hidden * out_pad + out_pad) * 4
    vmem_limit = int(3 * tile_bytes + 2 * weight_bytes) + (4 << 20)

    out_padded = pl.pallas_call(
        _mlp_kernel,
        out_shape=jax.ShapeDtypeStruct((padded_batch, out_pad), jnp.float32),
        grid_spec=pl.GridSpec(
            grid=(num_tiles,),
            in_specs=[
                # x: tiled along batch -> software-pipelined DMA.
                pl.BlockSpec((eff_tile, in_feature), lambda i: (i, 0)),
                # Weights / biases: constant index_map -> DMA'd once, VMEM-resident.
                pl.BlockSpec((in_feature, hidden), lambda i: (0, 0)),
                pl.BlockSpec((1, hidden), lambda i: (0, 0)),
                pl.BlockSpec((hidden, out_pad), lambda i: (0, 0)),
                pl.BlockSpec((1, out_pad), lambda i: (0, 0)),
            ],
            out_specs=pl.BlockSpec((eff_tile, out_pad), lambda i: (i, 0)),
        ),
        compiler_params=pltpu.CompilerParams(
            dimension_semantics=("parallel",),   # batch tiles independent -> megacore sharding
            vmem_limit_bytes=vmem_limit,
        ),
    )(x, w1, b1, w2p, b2p)

    return out_padded[:batch, :out_category]


def retailer_model_forward(x, w1, b1, w2, b2):
    """Dispatch: tiny batches go to the XLA-fused path; large batches use the Pallas kernel."""
    if x.shape[0] < MIN_PALLAS_BATCH:
        return jnp.tanh(x @ w1 + b1) @ w2 + b2
    return retailer_model_forward_pallas(x, w1, b1, w2, b2)


def init_params(key, in_feature, out_category):
    """Deterministic PyTorch-style (uniform +/- 1/sqrt(fan_in)) init, stored transposed."""
    k1, k2, k3, k4 = jax.random.split(key, 4)
    bound1 = 1.0 / jnp.sqrt(jnp.float32(in_feature))
    bound2 = 1.0 / jnp.sqrt(jnp.float32(HIDDEN_FEATURE))
    w1 = jax.random.uniform(k1, (in_feature, HIDDEN_FEATURE), jnp.float32, -bound1, bound1)
    b1 = jax.random.uniform(k2, (1, HIDDEN_FEATURE), jnp.float32, -bound1, bound1)
    w2 = jax.random.uniform(k3, (HIDDEN_FEATURE, out_category), jnp.float32, -bound2, bound2)
    b2 = jax.random.uniform(k4, (1, out_category), jnp.float32, -bound2, bound2)
    return w1, b1, w2, b2


if __name__ == "__main__":
    key = jax.random.PRNGKey(0)
    k_x, k_x2, k_p = jax.random.split(key, 3)

    in_feature = 32
    out_category = 4
    w1, b1, w2, b2 = init_params(k_p, in_feature, out_category)

    # Small demo batch (single tile) -- exercise the kernel directly.
    batch = 8
    x = jax.random.normal(k_x, (batch, in_feature), jnp.float32)
    out = retailer_model_forward_pallas(x, w1, b1, w2, b2)
    jax.block_until_ready(out)
    ref = jnp.tanh(x @ w1 + b1) @ w2 + b2
    assert out.shape == (batch, out_category)
    assert jnp.allclose(out, ref, atol=1e-4, rtol=1e-4)

    # Non-divisible batch with a small tile -- exercise multi-tile grid + remainder padding.
    batch2 = 200
    x2 = jax.random.normal(k_x2, (batch2, in_feature), jnp.float32)
    out2 = retailer_model_forward_pallas(x2, w1, b1, w2, b2, tile_b=64)
    jax.block_until_ready(out2)
    ref2 = jnp.tanh(x2 @ w1 + b1) @ w2 + b2
    assert out2.shape == (batch2, out_category)
    assert jnp.allclose(out2, ref2, atol=1e-4, rtol=1e-4)

    print("KERNEL_OK")
</pallas_src>

<mosaic_0001>
module attributes {stable_mosaic.version = 11 : i64} {
  func.func @_mlp_kernel(%arg0: i32, %arg1: memref<8x32xf32, #tpu.memory_space<vmem>>, %arg2: memref<32x16xf32, #tpu.memory_space<vmem>>, %arg3: memref<1x16xf32, #tpu.memory_space<vmem>>, %arg4: memref<16x128xf32, #tpu.memory_space<vmem>>, %arg5: memref<1x128xf32, #tpu.memory_space<vmem>>, %arg6: memref<8x128xf32, #tpu.memory_space<vmem>>) attributes {dimension_semantics = [#tpu.dimension_semantics<parallel>], iteration_bounds = array<i64: 1>, scalar_prefetch = 0 : i64, scratch_operands = 0 : i64, tpu.core_type = #tpu.core_type<tc>, window_params = [{transform_indices = @transform_0, window_bounds = array<i64: 8, 32>}, {pipeline_mode = #tpu.pipeline_mode<synchronous>, transform_indices = @transform_1, window_bounds = array<i64: 32, 16>}, {pipeline_mode = #tpu.pipeline_mode<synchronous>, transform_indices = @transform_2, window_bounds = array<i64: 1, 16>}, {pipeline_mode = #tpu.pipeline_mode<synchronous>, transform_indices = @transform_3, window_bounds = array<i64: 16, 128>}, {pipeline_mode = #tpu.pipeline_mode<synchronous>, transform_indices = @transform_4, window_bounds = array<i64: 1, 128>}, {transform_indices = @transform_5, window_bounds = array<i64: 8, 128>}]} {
    %c0 = arith.constant 0 : index
    %c0_0 = arith.constant 0 : index
    %0 = vector.load %arg1[%c0, %c0_0] : memref<8x32xf32, #tpu.memory_space<vmem>>, vector<8x32xf32>
    %c0_1 = arith.constant 0 : index
    %c0_2 = arith.constant 0 : index
    %1 = vector.load %arg2[%c0_1, %c0_2] : memref<32x16xf32, #tpu.memory_space<vmem>>, vector<32x16xf32>
    %c0_3 = arith.constant 0 : index
    %c0_4 = arith.constant 0 : index
    %2 = vector.load %arg3[%c0_3, %c0_4] : memref<1x16xf32, #tpu.memory_space<vmem>>, vector<1x16xf32>
    %c0_5 = arith.constant 0 : index
    %c0_6 = arith.constant 0 : index
    %3 = vector.load %arg4[%c0_5, %c0_6] : memref<16x128xf32, #tpu.memory_space<vmem>>, vector<16x128xf32>
    %c0_7 = arith.constant 0 : index
    %c0_8 = arith.constant 0 : index
    %4 = vector.load %arg5[%c0_7, %c0_8] : memref<1x128xf32, #tpu.memory_space<vmem>>, vector<1x128xf32>
    %cst = arith.constant dense<0.000000e+00> : vector<8x16xf32>
    %5 = tpu.matmul %0, %1, %cst {dimension_numbers = #tpu.dot_dimension_numbers<[1], [0], [0], [1], [0, 0, 1, 1], [], []>} : vector<8x32xf32>, vector<32x16xf32>, vector<8x16xf32> -> vector<8x16xf32>
    %6 = vector.broadcast %2 : vector<1x16xf32> to vector<8x16xf32>
    %7 = arith.addf %5, %6 : vector<8x16xf32>
    %8 = math.tanh %7 : vector<8x16xf32>
    %cst_9 = arith.constant dense<0.000000e+00> : vector<8x128xf32>
    %9 = tpu.matmul %8, %3, %cst_9 {dimension_numbers = #tpu.dot_dimension_numbers<[1], [0], [0], [1], [0, 0, 1, 1], [], []>} : vector<8x16xf32>, vector<16x128xf32>, vector<8x128xf32> -> vector<8x128xf32>
    %10 = vector.broadcast %4 : vector<1x128xf32> to vector<8x128xf32>
    %11 = arith.addf %9, %10 : vector<8x128xf32>
    %c0_10 = arith.constant 0 : index
    %c0_11 = arith.constant 0 : index
    %12 = vector.load %arg6[%c0_10, %c0_11] : memref<8x128xf32, #tpu.memory_space<vmem>>, vector<8x128xf32>
    tpu.vector_store %arg6[%c0_10, %c0_11], %11 {strides = array<i32>} : memref<8x128xf32, #tpu.memory_space<vmem>>, vector<8x128xf32>,
    return
  }
  func.func @transform_0(%arg0: i32) -> (i32, i32) {
    %c0_i32 = arith.constant 0 : i32
    %c0_i32_0 = arith.constant 0 : i32
    return %arg0, %c0_i32 : i32, i32
  }
  func.func @transform_1(%arg0: i32) -> (i32, i32) {
    %c0_i32 = arith.constant 0 : i32
    %c0_i32_0 = arith.constant 0 : i32
    %c0_i32_1 = arith.constant 0 : i32
    return %c0_i32, %c0_i32_0 : i32, i32
  }
  func.func @transform_2(%arg0: i32) -> (i32, i32) {
    %c0_i32 = arith.constant 0 : i32
    %c0_i32_0 = arith.constant 0 : i32
    %c0_i32_1 = arith.constant 0 : i32
    return %c0_i32, %c0_i32_0 : i32, i32
  }
  func.func @transform_3(%arg0: i32) -> (i32, i32) {
    %c0_i32 = arith.constant 0 : i32
    %c0_i32_0 = arith.constant 0 : i32
    %c0_i32_1 = arith.constant 0 : i32
    return %c0_i32, %c0_i32_0 : i32, i32
  }
  func.func @transform_4(%arg0: i32) -> (i32, i32) {
    %c0_i32 = arith.constant 0 : i32
    %c0_i32_0 = arith.constant 0 : i32
    %c0_i32_1 = arith.constant 0 : i32
    return %c0_i32, %c0_i32_0 : i32, i32
  }
  func.func @transform_5(%arg0: i32) -> (i32, i32) {
    %c0_i32 = arith.constant 0 : i32
    %c0_i32_0 = arith.constant 0 : i32
    return %arg0, %c0_i32 : i32, i32
  }
}

</mosaic_0001>

<bundles_post_ra>
// kernel: retailer_model_forward_pallas.1
= control target key start
LH: loop header
LB: loop body
LE: loop exit
PB: predicated region body
PF: predicated region fallthrough
CT: control target
= control target key end

     0   :  { %vm32_vm0 = vcmask 261120   ;;  %vm60_vm1 = vcmask 130048   ;;  %s155_s1 = inlined_call_operand.vmem [shape: f32[32,16], index: 1, kind: input, shape index: {}]   ;;  %s156_s2 = inlined_call_operand.vmem [shape: f32[1,16], index: 2, kind: input, shape index: {}]   ;;  %s157_s0 = inlined_call_operand.vmem [shape: f32[8,32], index: 0, kind: input, shape index: {}]   ;;  %s158_s4 = inlined_call_operand.vmem [shape: f32[1,128], index: 4, kind: input, shape index: {}]   ;;  %s159_s3 = inlined_call_operand.vmem [shape: f32[16,128], index: 3, kind: input, shape index: {}]   ;;  %s160_s5 = inlined_call_operand.vmem [shape: f32[8,128], index: 5, kind: output, shape index: {}]  }
   0x1   :  { %v24_v0 = vld [vmem:[%s155_s1 + $0x18] sm:$0xff]  ;;  %v23_v1 = vld [vmem:[%s155_s1 + $0x10] sm:$0xff]  ;;  %v22_v2 = vld [vmem:[%s155_s1 + $0x8] sm:$0xff] }
   0x2   :  { %48 = vmatpush.msra.mxu0 %v24_v0  ;;  %v21_v3 = vld [vmem:[%s155_s1] sm:$0xff]  ;;  %v27_v5 = vld [vmem:[%s159_s3 + $0x8] sm:$0xff] }
   0x3   :  { %v20_v4 = vld [vmem:[%s157_s0] sm:$0xff]  ;;  %78 = vmatpush.msra.mxu1 %v27_v5 }
   0x4   :  { %49 = vmatpush.msra.mxu0 %v23_v1  ;;  %v26_v6 = vld [vmem:[%s159_s3] sm:$0xff] }
   0x5   :  { %79 = vmatpush.msra.mxu1 %v26_v6  ;;  %v91_v7 = vld [vmem:[%s156_s2] ss:$0 sm:$0xff] }
   0x6   :  { %50 = vmatpush.msra.mxu0 %v22_v2  ;;  %v92_v11 = vld [vmem:[%s158_s4] ss:$0 sm:$0xff] }
   0x8   :  { %51 = vmatpush.msra.mxu0 %v21_v3 }
   0x9   :  { %89 = vmatmul.msk.f32.vlgmr.msra.gmra.mxu0 %vm32_vm0, %v20_v4 }
  0x86   :  { %v53_v8 = vpop.f32.mrf.mxu0 }
  0x87   :  { %v54_v9 = vadd.f32 %v91_v7, %v53_v8 }
  0x89   :  { %93 = vtanh.f32 %v54_v9 }
  0x8f   :  { %v94_v10 = vpop.eup %93 }
  0x90   :  { %90 = vmatmul.msk.f32.vlgmr.msra.gmra.mxu1 %vm60_vm1, %v94_v10 }
 0x10d   :  { %v81_v12 = vpop.f32.mrf.mxu1 }
 0x10e   :  { %v82_v13 = vadd.f32 %v92_v11, %v81_v12 }
 0x110   :  { %84 = vst [vmem:[%s160_s5] sm:$0xff] %v82_v13 }

</bundles_post_ra>
